<compile_context>
chip_gen: v7x
topology: tpu7x:2x2x1
jax: 0.10.0
libtpu: 0.0.40
codegen_flags: <defaults>
</compile_context>

<pallas_src>
import functools
import math

import jax
import jax.numpy as jnp
from jax.experimental import pallas as pl
from jax.experimental.pallas import tpu as pltpu

_LANE = 128  # lane width; q/k halves are padded to a multiple of this


def _self_attention_kernel(x_ref, w_ref, b_ref, out_ref):
    # x_ref  : (b_blk, t, data_dim)   batch block
    # w_ref  : (data_dim, 2*pad)      packed [Wq^T * scale | 0 | Wk^T | 0]
    # b_ref  : (1, 2*pad)             packed [bq * scale | 0 | bk | 0]
    # out_ref: (b_blk, t, t)
    bb, t, d = x_ref.shape
    two_pad = w_ref.shape[1]
    pad = two_pad // 2

    # Single fused MXU pass for both projections over the whole batch block:
    # (bb*t, d) @ (d, 2*pad). Merging leading dims is layout-free (minor dim
    # unchanged) and fills the MXU M dimension (bb*t rows).
    x2 = x_ref[...].reshape(bb * t, d)
    qk = jnp.dot(x2, w_ref[...], preferred_element_type=jnp.float32) + b_ref[...]
    qk = qk.reshape(bb, t, two_pad)

    # 128-lane-aligned slices: free vreg views, no lane shift / masking.
    q = qk[:, :, :pad]   # already scaled by 1/sqrt(data_dim) via weight packing
    k = qk[:, :, pad:]

    # scores[b, i, j] = sum_d q[b, i, d] * k[b, j, d]  (== Q @ K^T, batched).
    # Zero-padded lanes contribute exactly 0, so the padding is free.
    out_ref[...] = jax.lax.dot_general(
        q, k, (((2,), (2,)), ((0,), (0,))),
        preferred_element_type=jnp.float32)


def prepare_self_attention_params(w_q, b_q, w_k, b_k, data_dim):
    """One-time, host-side parameter packing (hoisted out of the per-step path).

    Args (PyTorch nn.Linear layout):
      w_q, w_k: (dim_q, data_dim)
      b_q, b_k: (dim_q,)
    Returns:
      w_qk: (data_dim, 2*pad) f32 — [Wq^T * scale | 0 | Wk^T | 0], pad = ceil128(dim_q)
      b_qk: (1, 2*pad)        f32 — [bq * scale | 0 | bk | 0]
    The 1/sqrt(data_dim) scale is folded into the q half here.
    """
    dim_q = w_q.shape[0]
    scale = 1.0 / math.sqrt(float(data_dim))
    pad = ((dim_q + _LANE - 1) // _LANE) * _LANE

    wq = jnp.zeros((data_dim, pad), jnp.float32).at[:, :dim_q].set(
        jnp.transpose(w_q).astype(jnp.float32) * scale)
    wk = jnp.zeros((data_dim, pad), jnp.float32).at[:, :dim_q].set(
        jnp.transpose(w_k).astype(jnp.float32))
    bq = jnp.zeros((1, pad), jnp.float32).at[0, :dim_q].set(
        b_q.astype(jnp.float32) * scale)
    bk = jnp.zeros((1, pad), jnp.float32).at[0, :dim_q].set(
        b_k.astype(jnp.float32))

    w_qk = jnp.concatenate([wq, wk], axis=1)
    b_qk = jnp.concatenate([bq, bk], axis=1)
    return w_qk, b_qk


@functools.partial(jax.jit, static_argnames=("batch_block",))
def self_attention_forward(x, w_qk, b_qk, *, batch_block=None):
    """SelfAttention forward.

    Args:
      x:     (b, t, data_dim) f32
      w_qk:  (data_dim, 2*pad) f32  (from prepare_self_attention_params)
      b_qk:  (1, 2*pad) f32
      batch_block: batch elements per grid step. Default = whole batch
        (best for single-TC v5e/v6e); use b // 2 on v7x with larger b so the
        2 TensorCores split the "parallel" batch axis.
    Returns:
      scaled_dot: (b, t, t) f32
    """
    b, t, d = x.shape
    if batch_block is None:
        batch_block = b
    assert b % batch_block == 0, (b, batch_block)
    grid = (b // batch_block,)
    two_pad = w_qk.shape[1]

    # Advisory cost hint: projection + score matmul flops, f32 I/O bytes.
    flops = 2 * b * t * d * two_pad + 2 * b * t * t * (two_pad // 2)
    bytes_accessed = 4 * (x.size + w_qk.size + b_qk.size + b * t * t)
    cost = pl.CostEstimate(flops=flops, transcendentals=0,
                           bytes_accessed=bytes_accessed)

    return pl.pallas_call(
        _self_attention_kernel,
        out_shape=jax.ShapeDtypeStruct((b, t, t), jnp.float32),
        grid=grid,
        in_specs=[
            # One batch block per grid step.
            pl.BlockSpec((batch_block, t, d), lambda i: (i, 0, 0)),
            # Packed weights / bias: same block for every grid step.
            pl.BlockSpec((d, two_pad), lambda i: (0, 0)),
            pl.BlockSpec((1, two_pad), lambda i: (0, 0)),
        ],
        out_specs=pl.BlockSpec((batch_block, t, t), lambda i: (i, 0, 0)),
        compiler_params=pltpu.CompilerParams(
            dimension_semantics=("parallel",)),
        cost_estimate=cost,
    )(x, w_qk, b_qk)


def _reference_forward(x, w_q, b_q, w_k, b_k):
    """Pure-JAX reference of the PyTorch module forward."""
    q = x @ jnp.transpose(w_q) + b_q                       # (b, t, dim_q)
    k = x @ jnp.transpose(w_k) + b_k                       # (b, t, dim_q)
    dot = jnp.einsum("btd,bsd->bts", q, k)                 # (b, t, t)
    return dot / jnp.sqrt(jnp.float32(x.shape[-1]))


if __name__ == "__main__":
    # Small config: batch=2, tokens=128, data_dim=32, dim_q=16.
    b, t, data_dim, dim_q = 2, 128, 32, 16

    key = jax.random.PRNGKey(0)
    kq_w, kq_b, kk_w, kk_b, kx = jax.random.split(key, 5)

    # PyTorch nn.Linear default init: U(-1/sqrt(in), 1/sqrt(in)).
    bound = 1.0 / math.sqrt(float(data_dim))
    w_q = jax.random.uniform(kq_w, (dim_q, data_dim), jnp.float32, -bound, bound)
    b_q = jax.random.uniform(kq_b, (dim_q,), jnp.float32, -bound, bound)
    w_k = jax.random.uniform(kk_w, (dim_q, data_dim), jnp.float32, -bound, bound)
    b_k = jax.random.uniform(kk_b, (dim_q,), jnp.float32, -bound, bound)

    x = jax.random.normal(kx, (b, t, data_dim), jnp.float32)

    # One-time parameter packing (scale folded into the q half).
    w_qk, b_qk = prepare_self_attention_params(w_q, b_q, w_k, b_k, data_dim)

    ref = _reference_forward(x, w_q, b_q, w_k, b_k)

    # Default path: whole batch in one grid step (v5e/v6e-friendly).
    out = self_attention_forward(x, w_qk, b_qk)
    jax.block_until_ready(out)
    assert out.shape == (b, t, t)
    assert jnp.allclose(out, ref, atol=1e-4, rtol=1e-4), (
        float(jnp.max(jnp.abs(out - ref))))

    # v7x-style path: batch split across grid steps ("parallel" axis / 2 TCs).
    out2 = self_attention_forward(x, w_qk, b_qk, batch_block=1)
    jax.block_until_ready(out2)
    assert jnp.allclose(out2, ref, atol=1e-4, rtol=1e-4), (
        float(jnp.max(jnp.abs(out2 - ref))))

    print("KERNEL_OK")
</pallas_src>

<mosaic_0001>
module attributes {stable_mosaic.version = 11 : i64} {
  func.func @_self_attention_kernel(%arg0: i32, %arg1: memref<2x128x32xf32, #tpu.memory_space<vmem>>, %arg2: memref<32x256xf32, #tpu.memory_space<vmem>>, %arg3: memref<1x256xf32, #tpu.memory_space<vmem>>, %arg4: memref<2x128x128xf32, #tpu.memory_space<vmem>>) attributes {dimension_semantics = [#tpu.dimension_semantics<parallel>], iteration_bounds = array<i64: 1>, scalar_prefetch = 0 : i64, scratch_operands = 0 : i64, tpu.core_type = #tpu.core_type<tc>, window_params = [{transform_indices = @transform_0, window_bounds = array<i64: 2, 128, 32>}, {pipeline_mode = #tpu.pipeline_mode<synchronous>, transform_indices = @transform_1, window_bounds = array<i64: 32, 256>}, {pipeline_mode = #tpu.pipeline_mode<synchronous>, transform_indices = @transform_2, window_bounds = array<i64: 1, 256>}, {transform_indices = @transform_3, window_bounds = array<i64: 2, 128, 128>}]} {
    %c0 = arith.constant 0 : index
    %c0_0 = arith.constant 0 : index
    %c0_1 = arith.constant 0 : index
    %0 = vector.load %arg1[%c0, %c0_0, %c0_1] : memref<2x128x32xf32, #tpu.memory_space<vmem>>, vector<2x128x32xf32>
    %1 = vector.shape_cast %0 : vector<2x128x32xf32> to vector<256x32xf32>
    %c0_2 = arith.constant 0 : index
    %c0_3 = arith.constant 0 : index
    %2 = vector.load %arg2[%c0_2, %c0_3] : memref<32x256xf32, #tpu.memory_space<vmem>>, vector<32x256xf32>
    %cst = arith.constant dense<0.000000e+00> : vector<256x256xf32>
    %3 = tpu.matmul %1, %2, %cst {dimension_numbers = #tpu.dot_dimension_numbers<[1], [0], [0], [1], [0, 0, 1, 1], [], []>} : vector<256x32xf32>, vector<32x256xf32>, vector<256x256xf32> -> vector<256x256xf32>
    %c0_4 = arith.constant 0 : index
    %c0_5 = arith.constant 0 : index
    %4 = vector.load %arg3[%c0_4, %c0_5] : memref<1x256xf32, #tpu.memory_space<vmem>>, vector<1x256xf32>
    %5 = vector.broadcast %4 : vector<1x256xf32> to vector<256x256xf32>
    %6 = arith.addf %3, %5 : vector<256x256xf32>
    %7 = vector.shape_cast %6 : vector<256x256xf32> to vector<2x128x256xf32>
    %8 = vector.extract_strided_slice %7 {offsets = [0, 0, 0], sizes = [2, 128, 128], strides = [1, 1, 1]} : vector<2x128x256xf32> to vector<2x128x128xf32>
    %9 = vector.extract_strided_slice %7 {offsets = [0, 0, 128], sizes = [2, 128, 128], strides = [1, 1, 1]} : vector<2x128x256xf32> to vector<2x128x128xf32>
    %cst_6 = arith.constant dense<0.000000e+00> : vector<2x128x128xf32>
    %10 = tpu.matmul %8, %9, %cst_6 {dimension_numbers = #tpu.dot_dimension_numbers<[2], [2], [1], [1], [0, 0, 0, 1, 1, 1], [0], [0]>} : vector<2x128x128xf32>, vector<2x128x128xf32>, vector<2x128x128xf32> -> vector<2x128x128xf32>
    %c0_7 = arith.constant 0 : index
    %c0_8 = arith.constant 0 : index
    %c0_9 = arith.constant 0 : index
    %11 = vector.load %arg4[%c0_7, %c0_8, %c0_9] : memref<2x128x128xf32, #tpu.memory_space<vmem>>, vector<2x128x128xf32>
    tpu.vector_store %arg4[%c0_7, %c0_8, %c0_9], %10 {strides = array<i32>} : memref<2x128x128xf32, #tpu.memory_space<vmem>>, vector<2x128x128xf32>,
    return
  }
  func.func @transform_0(%arg0: i32) -> (i32, i32, i32) {
    %c0_i32 = arith.constant 0 : i32
    %c0_i32_0 = arith.constant 0 : i32
    %c0_i32_1 = arith.constant 0 : i32
    return %arg0, %c0_i32, %c0_i32_0 : i32, i32, i32
  }
  func.func @transform_1(%arg0: i32) -> (i32, i32) {
    %c0_i32 = arith.constant 0 : i32
    %c0_i32_0 = arith.constant 0 : i32
    %c0_i32_1 = arith.constant 0 : i32
    return %c0_i32, %c0_i32_0 : i32, i32
  }
  func.func @transform_2(%arg0: i32) -> (i32, i32) {
    %c0_i32 = arith.constant 0 : i32
    %c0_i32_0 = arith.constant 0 : i32
    %c0_i32_1 = arith.constant 0 : i32
    return %c0_i32, %c0_i32_0 : i32, i32
  }
  func.func @transform_3(%arg0: i32) -> (i32, i32, i32) {
    %c0_i32 = arith.constant 0 : i32
    %c0_i32_0 = arith.constant 0 : i32
    %c0_i32_1 = arith.constant 0 : i32
    return %arg0, %c0_i32, %c0_i32_0 : i32, i32, i32
  }
}

</mosaic_0001>

<bundles_post_ra>
// kernel: self_attention_forward.1
= control target key start
LH: loop header
LB: loop body
LE: loop exit
PB: predicated region body
PF: predicated region fallthrough
CT: control target
= control target key end

     0   :  { %v1083_v7 = vmov 0.0   ;;  %vm67_vm0 = vcmask 261120   ;;  %s1437_s0 = inlined_call_operand.vmem [shape: f32[2,128,32], index: 0, kind: input, shape index: {}]   ;;  %s1438_s1 = inlined_call_operand.vmem [shape: f32[32,256], index: 1, kind: input, shape index: {}]   ;;  %s1439_s2 = inlined_call_operand.vmem [shape: f32[1,256], index: 2, kind: input, shape index: {}]   ;;  %s1440_s3 = inlined_call_operand.hbm [shape: f32[2,128,128], index: 3, kind: output, shape index: {}]  }
   0x1   :  { %v48_v0 = vld [vmem:[%s1438_s1 + $0x8] sm:$0xff]  ;;  %v50_v1 = vld [vmem:[%s1438_s1 + $0x18] sm:$0xff]  ;;  %v47_v2 = vld [vmem:[%s1438_s1] sm:$0xff]  ;;  %228 = vmatprep.mubr.f32.mxu0 %v1083_v7 }
   0x2   :  { %v967_v3 = vpack.c.bf16 %v50_v1, %v48_v0  ;;  %v49_v4 = vld [vmem:[%s1438_s1 + $0x10] sm:$0xff]  ;;  %v52_v5 = vld [vmem:[%s1438_s1 + $0x28] sm:$0xff]  ;;  %v54_v6 = vld [vmem:[%s1438_s1 + $0x38] sm:$0xff] }
   0x3   :  { %v969_v8 = vpack.c.bf16 %v49_v4, %v47_v2  ;;  %v971_v9 = vpack.c.bf16 %v54_v6, %v52_v5  ;;  %v51_v10 = vld [vmem:[%s1438_s1 + $0x20] sm:$0xff]  ;;  %v53_v11 = vld [vmem:[%s1438_s1 + $0x30] sm:$0xff]  ;;  %v16_v14 = vld [vmem:[%s1437_s0 + $0x8] sm:$0xff] }
   0x4   :  { %968 = vmatprep.subr.bf16.mxu0 %v967_v3  ;;  %v973_v12 = vpack.c.bf16 %v53_v11, %v51_v10  ;;  %v15_v13 = vld [vmem:[%s1437_s0] sm:$0xff] }
   0x5   :  { %970 = vmatpush1.bf16.msra.mxu0 %v969_v8 }
   0x6   :  { %972 = vmatprep.subr.bf16.mxu0 %v971_v9 }
   0x9   :  { %974 = vmatpush1.bf16.msra.mxu0 %v973_v12 }
   0xc   :  { %759 = vmatmul.mubr.msk.f32.vlgmr.msra.gmra.mrb[0].mxu0 %vm67_vm0, %v15_v13 }
   0xd   :  { %234 = vmatprep.mubr.f32.mxu0 %v1083_v7 }
   0xe   :  { %8 = vsyncpa [#allocation3], 0  ;;  %v17_v15 = vld [vmem:[%s1437_s0 + $0x10] sm:$0xff]  ;;  %v18_v16 = vld [vmem:[%s1437_s0 + $0x18] sm:$0xff]  ;;  %v57_v45 = vlaneseq }
   0xf   :  { %v19_v17 = vld [vmem:[%s1437_s0 + $0x20] sm:$0xff]  ;;  %v20_v18 = vld [vmem:[%s1437_s0 + $0x28] sm:$0xff]  ;;  %v21_v19 = vld [vmem:[%s1437_s0 + $0x30] sm:$0xff] }
  0x10   :  { %760 = vmatmul.mubr.msk.f32.gmra.mrb[2].mxu0 %vm67_vm0, %v16_v14  ;;  %v22_v20 = vld [vmem:[%s1437_s0 + $0x38] sm:$0xff]  ;;  %v23_v21 = vld [vmem:[%s1437_s0 + $0x40] sm:$0xff]  ;;  %v24_v22 = vld [vmem:[%s1437_s0 + $0x48] sm:$0xff]  ;;  %v58_v46 = vshrl.u32 %v57_v45, 7 }
  0x11   :  { %240 = vmatprep.mubr.f32.mxu0 %v1083_v7  ;;  %v25_v23 = vld [vmem:[%s1437_s0 + $0x50] sm:$0xff]  ;;  %v26_v24 = vld [vmem:[%s1437_s0 + $0x58] sm:$0xff]  ;;  %v27_v25 = vld [vmem:[%s1437_s0 + $0x60] sm:$0xff] }
  0x12   :  { %v28_v26 = vld [vmem:[%s1437_s0 + $0x68] sm:$0xff]  ;;  %v29_v27 = vld [vmem:[%s1437_s0 + $0x70] sm:$0xff]  ;;  %v30_v28 = vld [vmem:[%s1437_s0 + $0x78] sm:$0xff]  ;;  %v59_v47 = vsub.s32 0, %v58_v46  ;;  %v63_v50 = vsub.s32 1, %v58_v46 }
  0x13   :  { %v31_v29 = vld [vmem:[%s1437_s0 + $0x80] sm:$0xff]  ;;  %v32_v30 = vld [vmem:[%s1437_s0 + $0x88] sm:$0xff]  ;;  %v33_v31 = vld [vmem:[%s1437_s0 + $0x90] sm:$0xff] }
  0x14   :  { %761 = vmatmul.mubr.msk.f32.gmra.mrb[4].mxu0 %vm67_vm0, %v17_v15  ;;  %v34_v32 = vld [vmem:[%s1437_s0 + $0x98] sm:$0xff]  ;;  %v35_v33 = vld [vmem:[%s1437_s0 + $0xa0] sm:$0xff]  ;;  %v36_v34 = vld [vmem:[%s1437_s0 + $0xa8] sm:$0xff] }
  0x15   :  { %246 = vmatprep.mubr.f32.mxu0 %v1083_v7  ;;  %v37_v35 = vld [vmem:[%s1437_s0 + $0xb0] sm:$0xff]  ;;  %v38_v36 = vld [vmem:[%s1437_s0 + $0xb8] sm:$0xff]  ;;  %v39_v37 = vld [vmem:[%s1437_s0 + $0xc0] sm:$0xff] }
  0x16   :  { %v40_v38 = vld [vmem:[%s1437_s0 + $0xc8] sm:$0xff]  ;;  %v41_v39 = vld [vmem:[%s1437_s0 + $0xd0] sm:$0xff]  ;;  %v42_v40 = vld [vmem:[%s1437_s0 + $0xd8] sm:$0xff] }
  0x17   :  { %v43_v41 = vld [vmem:[%s1437_s0 + $0xe0] sm:$0xff]  ;;  %v44_v42 = vld [vmem:[%s1437_s0 + $0xe8] sm:$0xff]  ;;  %v45_v43 = vld [vmem:[%s1437_s0 + $0xf0] sm:$0xff] }
  0x18   :  { %762 = vmatmul.mubr.msk.f32.gmra.mrb[6].mxu0 %vm67_vm0, %v18_v16  ;;  %v46_v44 = vld [vmem:[%s1437_s0 + $0xf8] sm:$0xff]  ;;  %v55_v48 = vld [vmem:[%s1439_s2] sm:$0x3]  ;;  %s1084_s0 = smov [#allocation2]  }
  0x19   :  { %252 = vmatprep.mubr.f32.mxu0 %v1083_v7  ;;  %v1294_v49 = vrot.slane %v55_v48, %v59_v47  ;;  %v1297_v54 = vrot.slane %v55_v48, %v63_v50  ;;  %s748_s2 = sshll.u32 %s1084_s0, 4  ;;  %s749_s2 = int_to_ptr.vmem [resolvable:$true] %s748_s2 }
  0x1a   :  { %s1059_s10 = scalar_lea.vmem %s749_s2, 4096  ;;  %p1064_p1 = scmp.lt.s32.totalorder %s749_s2, %s749_s2 }
  0x1b   :  { %p1060_p0 = scmp.ne.s32.totalorder %s749_s2, %s1059_s10  ;;  %p1065_p2 = scmp.lt.s32.totalorder %s1059_s10, %s1059_s10 }
  0x1c   :  { %763 = vmatmul.mubr.msk.f32.gmra.mrb[8].mxu0 %vm67_vm0, %v19_v17 }
  0x1d   :  { %258 = vmatprep.mubr.f32.mxu0 %v1083_v7  ;;  %p1066_p3 = por %p1065_p2, %p1064_p1 }
  0x1f   :  { %p1067_p4 = pnand %p1066_p3, %p1060_p0 }
  0x20   :  { %764 = vmatmul.mubr.msk.f32.gmra.mrb[10].mxu0 %vm67_vm0, %v20_v18 }
  0x21   :  { %264 = vmatprep.mubr.f32.mxu0 %v1083_v7 }
  0x24   :  { %765 = vmatmul.mubr.msk.f32.gmra.mrb[12].mxu0 %vm67_vm0, %v21_v19 }
  0x25   :  { %270 = vmatprep.mubr.f32.mxu0 %v1083_v7 }
  0x28   :  { %766 = vmatmul.mubr.msk.f32.gmra.mrb[14].mxu0 %vm67_vm0, %v22_v20 }
  0x29   :  { %276 = vmatprep.mubr.f32.mxu0 %v1083_v7 }
  0x2c   :  { %767 = vmatmul.mubr.msk.f32.gmra.mrb[16].mxu0 %vm67_vm0, %v23_v21 }
  0x2d   :  { %282 = vmatprep.mubr.f32.mxu0 %v1083_v7 }
  0x30   :  { %768 = vmatmul.mubr.msk.f32.gmra.mrb[18].mxu0 %vm67_vm0, %v24_v22 }
  0x31   :  { %288 = vmatprep.mubr.f32.mxu0 %v1083_v7 }
  0x34   :  { %769 = vmatmul.mubr.msk.f32.gmra.mrb[20].mxu0 %vm67_vm0, %v25_v23 }
  0x35   :  { %294 = vmatprep.mubr.f32.mxu0 %v1083_v7 }
  0x38   :  { %770 = vmatmul.mubr.msk.f32.gmra.mrb[22].mxu0 %vm67_vm0, %v26_v24 }
  0x39   :  { %300 = vmatprep.mubr.f32.mxu0 %v1083_v7 }
  0x3c   :  { %771 = vmatmul.mubr.msk.f32.gmra.mrb[24].mxu0 %vm67_vm0, %v27_v25 }
  0x3d   :  { %306 = vmatprep.mubr.f32.mxu0 %v1083_v7 }
  0x40   :  { %772 = vmatmul.mubr.msk.f32.gmra.mrb[26].mxu0 %vm67_vm0, %v28_v26 }
  0x41   :  { %312 = vmatprep.mubr.f32.mxu0 %v1083_v7 }
  0x44   :  { %773 = vmatmul.mubr.msk.f32.gmra.mrb[28].mxu0 %vm67_vm0, %v29_v27 }
  0x45   :  { %318 = vmatprep.mubr.f32.mxu0 %v1083_v7 }
  0x48   :  { %774 = vmatmul.mubr.msk.f32.gmra.mrb[30].mxu0 %vm67_vm0, %v30_v28 }
  0x49   :  { %324 = vmatprep.mubr.f32.mxu0 %v1083_v7 }
  0x4c   :  { %775 = vmatmul.mubr.msk.f32.gmra.mrb[32].mxu0 %vm67_vm0, %v31_v29 }
  0x4d   :  { %330 = vmatprep.mubr.f32.mxu0 %v1083_v7 }
  0x50   :  { %776 = vmatmul.mubr.msk.f32.gmra.mrb[34].mxu0 %vm67_vm0, %v32_v30 }
  0x51   :  { %336 = vmatprep.mubr.f32.mxu0 %v1083_v7 }
  0x54   :  { %777 = vmatmul.mubr.msk.f32.gmra.mrb[36].mxu0 %vm67_vm0, %v33_v31 }
  0x55   :  { %342 = vmatprep.mubr.f32.mxu0 %v1083_v7 }
  0x58   :  { %778 = vmatmul.mubr.msk.f32.gmra.mrb[38].mxu0 %vm67_vm0, %v34_v32 }
  0x59   :  { %348 = vmatprep.mubr.f32.mxu0 %v1083_v7 }
  0x5c   :  { %779 = vmatmul.mubr.msk.f32.gmra.mrb[40].mxu0 %vm67_vm0, %v35_v33 }
  0x5d   :  { %354 = vmatprep.mubr.f32.mxu0 %v1083_v7 }
  0x60   :  { %780 = vmatmul.mubr.msk.f32.gmra.mrb[42].mxu0 %vm67_vm0, %v36_v34 }
  0x61   :  { %360 = vmatprep.mubr.f32.mxu0 %v1083_v7 }
  0x64   :  { %781 = vmatmul.mubr.msk.f32.gmra.mrb[44].mxu0 %vm67_vm0, %v37_v35 }
  0x65   :  { %366 = vmatprep.mubr.f32.mxu0 %v1083_v7 }
  0x68   :  { %782 = vmatmul.mubr.msk.f32.gmra.mrb[46].mxu0 %vm67_vm0, %v38_v36 }
  0x69   :  { %372 = vmatprep.mubr.f32.mxu0 %v1083_v7 }
  0x6c   :  { %783 = vmatmul.mubr.msk.f32.gmra.mrb[48].mxu0 %vm67_vm0, %v39_v37 }
  0x6d   :  { %378 = vmatprep.mubr.f32.mxu0 %v1083_v7 }
  0x70   :  { %784 = vmatmul.mubr.msk.f32.gmra.mrb[50].mxu0 %vm67_vm0, %v40_v38 }
  0x71   :  { %384 = vmatprep.mubr.f32.mxu0 %v1083_v7 }
  0x74   :  { %785 = vmatmul.mubr.msk.f32.gmra.mrb[52].mxu0 %vm67_vm0, %v41_v39 }
  0x75   :  { %390 = vmatprep.mubr.f32.mxu0 %v1083_v7 }
  0x78   :  { %786 = vmatmul.mubr.msk.f32.gmra.mrb[54].mxu0 %vm67_vm0, %v42_v40 }
  0x79   :  { %396 = vmatprep.mubr.f32.mxu0 %v1083_v7 }
  0x7c   :  { %787 = vmatmul.mubr.msk.f32.gmra.mrb[56].mxu0 %vm67_vm0, %v43_v41 }
  0x7d   :  { %402 = vmatprep.mubr.f32.mxu0 %v1083_v7 }
  0x80   :  { %788 = vmatmul.mubr.msk.f32.gmra.mrb[58].mxu0 %vm67_vm0, %v44_v42 }
  0x81   :  { %408 = vmatprep.mubr.f32.mxu0 %v1083_v7 }
  0x84   :  { %789 = vmatmul.mubr.msk.f32.gmra.mrb[60].mxu0 %vm67_vm0, %v45_v43 }
  0x85   :  { %414 = vmatprep.mubr.f32.mxu0 %v1083_v7 }
  0x88   :  { %790 = vmatmul.mubr.msk.f32.gmra.mrb[62].mxu0 %vm67_vm0, %v46_v44 }
  0xdf   :  { %v230_v51 = vpop.f32.mrb[0].mxu0 }
  0xe0   :  { %v232_v52 = vpop.f32.mrb[1].mxu0  ;;  %v231_v53 = vadd.f32 %v230_v51, %v1294_v49 }
  0xe1   :  { %v233_v57 = vadd.f32 %v232_v52, %v1297_v54 }
  0xe2   :  { %887 = vmatprep.mubr.f32.mxu1 %v231_v53 }
  0xe3   :  { %v1299_v55 = vpop.f32.mrb[2].mxu0 }
  0xe4   :  { %v238_v56 = vpop.f32.mrb[3].mxu0  ;;  %v237_v53 = vadd.f32 %v1299_v55, %v1294_v49 }
  0xe5   :  { %v239_v58 = vadd.f32 %v238_v56, %v1297_v54 }
  0xe7   :  { %v1303_v59 = vpop.f32.mrb[4].mxu0  ;;  %v975_v60 = vpack.c.bf16 %v239_v58, %v233_v57 }
  0xe8   :  { %v244_v61 = vpop.f32.mrb[5].mxu0  ;;  %v243_v58 = vadd.f32 %v1303_v59, %v1294_v49 }
  0xe9   :  { %976 = vmatprep.subr.bf16.mxu1 %v975_v60  ;;  %v245_v0 = vadd.f32 %v244_v61, %v1297_v54 }
  0xea   :  { %978 = vmatpush3.bf16.xpose.msra.mxu1 %v975_v60 }
  0xeb   :  { %v1305_v62 = vpop.f32.mrb[6].mxu0 }
  0xec   :  { %v250_v63 = vpop.f32.mrb[7].mxu0  ;;  %v249_v61 = vadd.f32 %v1305_v62, %v1294_v49 }
  0xed   :  { %v251_v1 = vadd.f32 %v250_v63, %v1297_v54 }
  0xef   :  { %v979_v2 = vpack.c.bf16 %v251_v1, %v245_v0  ;;  %v1309_v3 = vpop.f32.mrb[8].mxu0 }
  0xf0   :  { %v256_v4 = vpop.f32.mrb[9].mxu0  ;;  %v255_v55 = vadd.f32 %v1309_v3, %v1294_v49 }
  0xf1   :  { %980 = vmatprep.subr.bf16.mxu1 %v979_v2  ;;  %v257_v7 = vadd.f32 %v256_v4, %v1297_v54 }
  0xf2   :  { %982 = vmatpush3.bf16.xpose.msra.mxu1 %v979_v2 }
  0xf3   :  { %v1311_v5 = vpop.f32.mrb[10].mxu0 }
  0xf4   :  { %v262_v6 = vpop.f32.mrb[11].mxu0  ;;  %v261_v2 = vadd.f32 %v1311_v5, %v1294_v49 }
  0xf5   :  { %v263_v8 = vadd.f32 %v262_v6, %v1297_v54 }
  0xf7   :  { %v983_v9 = vpack.c.bf16 %v263_v8, %v257_v7  ;;  %v1315_v10 = vpop.f32.mrb[12].mxu0 }
  0xf8   :  { %v268_v11 = vpop.f32.mrb[13].mxu0  ;;  %v267_v62 = vadd.f32 %v1315_v10, %v1294_v49 }
  0xf9   :  { %984 = vmatprep.subr.bf16.mxu1 %v983_v9  ;;  %v269_v14 = vadd.f32 %v268_v11, %v1297_v54 }
  0xfa   :  { %986 = vmatpush3.bf16.xpose.msra.mxu1 %v983_v9 }
  0xfb   :  { %v1317_v12 = vpop.f32.mrb[14].mxu0 }
  0xfc   :  { %v274_v13 = vpop.f32.mrb[15].mxu0  ;;  %v273_v3 = vadd.f32 %v1317_v12, %v1294_v49 }
  0xfd   :  { %v275_v15 = vadd.f32 %v274_v13, %v1297_v54 }
  0xff   :  { %v987_v16 = vpack.c.bf16 %v275_v15, %v269_v14  ;;  %v1321_v17 = vpop.f32.mrb[16].mxu0 }
 0x100   :  { %v280_v18 = vpop.f32.mrb[17].mxu0  ;;  %v279_v5 = vadd.f32 %v1321_v17, %v1294_v49 }
 0x101   :  { %988 = vmatprep.subr.bf16.mxu1 %v987_v16  ;;  %v281_v21 = vadd.f32 %v280_v18, %v1297_v54 }
 0x102   :  { %990 = vmatpush3.bf16.xpose.msra.mxu1 %v987_v16 }
 0x103   :  { %v1323_v19 = vpop.f32.mrb[18].mxu0 }
 0x104   :  { %v286_v20 = vpop.f32.mrb[19].mxu0  ;;  %v285_v13 = vadd.f32 %v1323_v19, %v1294_v49 }
 0x105   :  { %v287_v22 = vadd.f32 %v286_v20, %v1297_v54 }
 0x107   :  { %v991_v23 = vpack.c.bf16 %v287_v22, %v281_v21  ;;  %v1327_v24 = vpop.f32.mrb[20].mxu0 }
 0x108   :  { %v292_v25 = vpop.f32.mrb[21].mxu0  ;;  %v291_v12 = vadd.f32 %v1327_v24, %v1294_v49 }
 0x109   :  { %992 = vmatprep.subr.bf16.mxu1 %v991_v23  ;;  %v293_v28 = vadd.f32 %v292_v25, %v1297_v54 }
 0x10a   :  { %994 = vmatpush3.bf16.xpose.msra.mxu1 %v991_v23 }
 0x10b   :  { %v1329_v26 = vpop.f32.mrb[22].mxu0 }
 0x10c   :  { %v298_v27 = vpop.f32.mrb[23].mxu0  ;;  %v297_v17 = vadd.f32 %v1329_v26, %v1294_v49 }
 0x10d   :  { %v299_v29 = vadd.f32 %v298_v27, %v1297_v54 }
 0x10f   :  { %v995_v30 = vpack.c.bf16 %v299_v29, %v293_v28  ;;  %v1333_v31 = vpop.f32.mrb[24].mxu0 }
 0x110   :  { %v304_v32 = vpop.f32.mrb[25].mxu0  ;;  %v303_v19 = vadd.f32 %v1333_v31, %v1294_v49 }
 0x111   :  { %996 = vmatprep.subr.bf16.mxu1 %v995_v30  ;;  %v305_v35 = vadd.f32 %v304_v32, %v1297_v54 }
 0x112   :  { %998 = vmatpush3.bf16.xpose.msra.mxu1 %v995_v30 }
 0x113   :  { %v1335_v33 = vpop.f32.mrb[26].mxu0 }
 0x114   :  { %v310_v34 = vpop.f32.mrb[27].mxu0  ;;  %v309_v23 = vadd.f32 %v1335_v33, %v1294_v49 }
 0x115   :  { %v311_v36 = vadd.f32 %v310_v34, %v1297_v54 }
 0x117   :  { %v999_v37 = vpack.c.bf16 %v311_v36, %v305_v35  ;;  %v1339_v38 = vpop.f32.mrb[28].mxu0 }
 0x118   :  { %v316_v39 = vpop.f32.mrb[29].mxu0  ;;  %v315_v26 = vadd.f32 %v1339_v38, %v1294_v49 }
 0x119   :  { %1000 = vmatprep.subr.bf16.mxu1 %v999_v37  ;;  %v317_v42 = vadd.f32 %v316_v39, %v1297_v54 }
 0x11a   :  { %1002 = vmatpush3.bf16.xpose.msra.mxu1 %v999_v37 }
 0x11b   :  { %v1341_v40 = vpop.f32.mrb[30].mxu0 }
 0x11c   :  { %v322_v41 = vpop.f32.mrb[31].mxu0  ;;  %v321_v28 = vadd.f32 %v1341_v40, %v1294_v49 }
 0x11d   :  { %v323_v43 = vadd.f32 %v322_v41, %v1297_v54 }
 0x11f   :  { %v1003_v44 = vpack.c.bf16 %v323_v43, %v317_v42  ;;  %v326_v45 = vpop.f32.mrb[32].mxu0 }
 0x120   :  { %v327_v46 = vadd.f32 %v326_v45, %v1294_v49  ;;  %v328_v47 = vpop.f32.mrb[33].mxu0 }
 0x121   :  { %1004 = vmatprep.subr.bf16.mxu1 %v1003_v44  ;;  %v329_v51 = vadd.f32 %v328_v47, %v1297_v54 }
 0x122   :  { %1006 = vmatpush3.bf16.xpose.msra.mxu1 %v1003_v44  ;;  %943 = vmatprep.mubr.f32.mxu0 %v327_v46 }
 0x123   :  { %v1346_v48 = vpop.f32.mrb[34].mxu0 }
 0x124   :  { %v334_v50 = vpop.f32.mrb[35].mxu0 }
 0x125   :  { %v335_v52 = vadd.f32 %v334_v50, %v1297_v54 }
 0x127   :  { %v1007_v56 = vpack.c.bf16 %v335_v52, %v329_v51  ;;  %v1352_v57 = vpop.f32.mrb[36].mxu0 }
 0x128   :  { %v340_v60 = vpop.f32.mrb[37].mxu0 }
 0x129   :  { %888 = vmatmul.mubr.f32.vlgmr.msra.gmra.mrb[0].mxu1 %v237_v53  ;;  %1008 = vmatprep.subr.bf16.mxu0 %v1007_v56  ;;  %v341_v1 = vadd.f32 %v340_v60, %v1297_v54 }
 0x12a   :  { %1039 = vmatprep.subr.bf16.mxu1 %v1007_v56  ;;  %890 = vmatprep.mubr.f32.mxu1 %v243_v58 }
 0x12b   :  { %1010 = vmatpush3.bf16.xpose.msra.mxu0 %v1007_v56  ;;  %1047 = vmatpush3.bf16.xpose.msra.mxu1 %v1007_v56  ;;  %v1358_v63 = vpop.f32.mrb[38].mxu0 }
 0x12c   :  { %v346_v0 = vpop.f32.mrb[39].mxu0 }
 0x12d   :  { %v347_v59 = vadd.f32 %v346_v0, %v1297_v54  ;;  %891 = vmatmul.mubr.f32.gmra.mrb[2].mxu1 %v249_v61 }
 0x12e   :  { %893 = vmatprep.mubr.f32.mxu1 %v255_v55  ;;  %v333_v55 = vadd.f32 %v1346_v48, %v1294_v49 }
 0x12f   :  { %v1011_v4 = vpack.c.bf16 %v347_v59, %v341_v1  ;;  %v1366_v6 = vpop.f32.mrb[40].mxu0  ;;  %v339_v1 = vadd.f32 %v1352_v57, %v1294_v49 }
 0x130   :  { %v352_v7 = vpop.f32.mrb[41].mxu0  ;;  %v351_v48 = vadd.f32 %v1366_v6, %v1294_v49 }
 0x131   :  { %894 = vmatmul.mubr.f32.gmra.mrb[4].mxu1 %v261_v2  ;;  %1012 = vmatprep.subr.bf16.mxu0 %v1011_v4  ;;  %v353_v11 = vadd.f32 %v352_v7, %v1297_v54 }
 0x132   :  { %1040 = vmatprep.subr.bf16.mxu1 %v1011_v4  ;;  %896 = vmatprep.mubr.f32.mxu1 %v267_v62 }
 0x133   :  { %1014 = vmatpush3.bf16.xpose.msra.mxu0 %v1011_v4  ;;  %1048 = vmatpush3.bf16.xpose.msra.mxu1 %v1011_v4  ;;  %v1372_v8 = vpop.f32.mrb[42].mxu0 }
 0x134   :  { %v358_v9 = vpop.f32.mrb[43].mxu0  ;;  %v357_v57 = vadd.f32 %v1372_v8, %v1294_v49 }
 0x135   :  { %v359_v10 = vadd.f32 %v358_v9, %v1297_v54  ;;  %897 = vmatmul.mubr.f32.gmra.mrb[6].mxu1 %v273_v3 }
 0x136   :  { %899 = vmatprep.mubr.f32.mxu1 %v279_v5 }
 0x137   :  { %v1015_v14 = vpack.c.bf16 %v359_v10, %v353_v11  ;;  %v362_v15 = vpop.f32.mrb[44].mxu0 }
 0x138   :  { %v364_v16 = vpop.f32.mrb[45].mxu0  ;;  %v363_v30 = vadd.f32 %v362_v15, %v1294_v49 }
 0x139   :  { %900 = vmatmul.mubr.f32.gmra.mrb[8].mxu1 %v285_v13  ;;  %1016 = vmatprep.subr.bf16.mxu0 %v1015_v14  ;;  %v365_v21 = vadd.f32 %v364_v16, %v1297_v54 }
 0x13a   :  { %1041 = vmatprep.subr.bf16.mxu1 %v1015_v14  ;;  %902 = vmatprep.mubr.f32.mxu1 %v291_v12 }
 0x13b   :  { %1018 = vmatpush3.bf16.xpose.msra.mxu0 %v1015_v14  ;;  %1049 = vmatpush3.bf16.xpose.msra.mxu1 %v1015_v14  ;;  %v1384_v18 = vpop.f32.mrb[46].mxu0 }
 0x13c   :  { %v370_v20 = vpop.f32.mrb[47].mxu0  ;;  %v369_v0 = vadd.f32 %v1384_v18, %v1294_v49 }
 0x13d   :  { %v371_v22 = vadd.f32 %v370_v20, %v1297_v54  ;;  %903 = vmatmul.mubr.f32.gmra.mrb[10].mxu1 %v297_v17 }
 0x13e   :  { %905 = vmatprep.mubr.f32.mxu1 %v303_v19 }
 0x13f   :  { %v1019_v24 = vpack.c.bf16 %v371_v22, %v365_v21  ;;  %v374_v25 = vpop.f32.mrb[48].mxu0 }
 0x140   :  { %v376_v27 = vpop.f32.mrb[49].mxu0  ;;  %v375_v59 = vadd.f32 %v374_v25, %v1294_v49 }
 0x141   :  { %906 = vmatmul.mubr.f32.gmra.mrb[12].mxu1 %v309_v23  ;;  %1020 = vmatprep.subr.bf16.mxu0 %v1019_v24  ;;  %v377_v32 = vadd.f32 %v376_v27, %v1297_v54 }
 0x142   :  { %1042 = vmatprep.subr.bf16.mxu1 %v1019_v24  ;;  %908 = vmatprep.mubr.f32.mxu1 %v315_v26 }
 0x143   :  { %1022 = vmatpush3.bf16.xpose.msra.mxu0 %v1019_v24  ;;  %1050 = vmatpush3.bf16.xpose.msra.mxu1 %v1019_v24  ;;  %v380_v29 = vpop.f32.mrb[50].mxu0 }
 0x144   :  { %v382_v31 = vpop.f32.mrb[51].mxu0  ;;  %v381_v2 = vadd.f32 %v380_v29, %v1294_v49 }
 0x145   :  { %v383_v33 = vadd.f32 %v382_v31, %v1297_v54  ;;  %909 = vmatmul.mubr.f32.gmra.mrb[14].mxu1 %v321_v28 }
 0x146   :  { %952 = vmatprep.mubr.f32.mxu1 %v363_v30 }
 0x147   :  { %v1023_v34 = vpack.c.bf16 %v383_v33, %v377_v32  ;;  %v386_v35 = vpop.f32.mrb[52].mxu0 }
 0x148   :  { %v388_v36 = vpop.f32.mrb[53].mxu0  ;;  %v387_v4 = vadd.f32 %v386_v35, %v1294_v49 }
 0x149   :  { %1024 = vmatprep.subr.bf16.mxu0 %v1023_v34  ;;  %1043 = vmatprep.subr.bf16.mxu1 %v1023_v34  ;;  %v389_v39 = vadd.f32 %v388_v36, %v1297_v54 }
 0x14b   :  { %1026 = vmatpush3.bf16.xpose.msra.mxu0 %v1023_v34  ;;  %1051 = vmatpush3.bf16.xpose.msra.mxu1 %v1023_v34  ;;  %v392_v37 = vpop.f32.mrb[54].mxu0 }
 0x14c   :  { %v394_v38 = vpop.f32.mrb[55].mxu0  ;;  %v393_v62 = vadd.f32 %v392_v37, %v1294_v49 }
 0x14d   :  { %v395_v40 = vadd.f32 %v394_v38, %v1297_v54 }
 0x14f   :  { %v1027_v41 = vpack.c.bf16 %v395_v40, %v389_v39  ;;  %v398_v42 = vpop.f32.mrb[56].mxu0 }
 0x150   :  { %v400_v43 = vpop.f32.mrb[57].mxu0  ;;  %v399_v7 = vadd.f32 %v398_v42, %v1294_v49 }
 0x151   :  { %1028 = vmatprep.subr.bf16.mxu0 %v1027_v41  ;;  %1044 = vmatprep.subr.bf16.mxu1 %v1027_v41  ;;  %v401_v46 = vadd.f32 %v400_v43, %v1297_v54 }
 0x153   :  { %1030 = vmatpush3.bf16.xpose.msra.mxu0 %v1027_v41  ;;  %1052 = vmatpush3.bf16.xpose.msra.mxu1 %v1027_v41  ;;  %v404_v44 = vpop.f32.mrb[58].mxu0 }
 0x154   :  { %v406_v45 = vpop.f32.mrb[59].mxu0 }
 0x155   :  { %v407_v47 = vadd.f32 %v406_v45, %v1297_v54 }
 0x157   :  { %v1031_v50 = vpack.c.bf16 %v407_v47, %v401_v46  ;;  %v410_v51 = vpop.f32.mrb[60].mxu0 }
 0x158   :  { %v412_v52 = vpop.f32.mrb[61].mxu0  ;;  %v411_v6 = vadd.f32 %v410_v51, %v1294_v49 }
 0x159   :  { %1032 = vmatprep.subr.bf16.mxu0 %v1031_v50  ;;  %1045 = vmatprep.subr.bf16.mxu1 %v1031_v50  ;;  %v413_v58 = vadd.f32 %v412_v52, %v1297_v54 }
 0x15b   :  { %1034 = vmatpush3.bf16.xpose.msra.mxu0 %v1031_v50  ;;  %1053 = vmatpush3.bf16.xpose.msra.mxu1 %v1031_v50  ;;  %v416_v53 = vpop.f32.mrb[62].mxu0 }
 0x15c   :  { %v418_v56 = vpop.f32.mrb[63].mxu0  ;;  %v417_v3 = vadd.f32 %v416_v53, %v1294_v49 }
 0x15d   :  { %v419_v60 = vadd.f32 %v418_v56, %v1297_v54  ;;  %v345_v54 = vadd.f32 %v1358_v63, %v1294_v49  ;;  %v405_v63 = vadd.f32 %v404_v44, %v1294_v49 }
 0x15f   :  { %v1035_v61 = vpack.c.bf16 %v419_v60, %v413_v58 }
 0x161   :  { %1036 = vmatprep.subr.bf16.mxu0 %v1035_v61  ;;  %1046 = vmatprep.subr.bf16.mxu1 %v1035_v61 }
 0x163   :  { %1038 = vmatpush3.bf16.xpose.msra.mxu0 %v1035_v61  ;;  %1054 = vmatpush3.bf16.xpose.msra.mxu1 %v1035_v61 }
 0x16a   :  { %944 = vmatmul.mubr.f32.vlgmr.msra.gmra.mrb[64].mxu0 %v333_v55  ;;  %953 = vmatmul.mubr.f32.vlgmr.msra.gmra.mrb[16].mxu1 %v369_v0 }
 0x16b   :  { %946 = vmatprep.mubr.f32.mxu0 %v339_v1  ;;  %955 = vmatprep.mubr.f32.mxu1 %v375_v59 }
 0x16e   :  { %947 = vmatmul.mubr.f32.gmra.mrb[66].mxu0 %v345_v54  ;;  %956 = vmatmul.mubr.f32.gmra.mrb[18].mxu1 %v381_v2 }
 0x16f   :  { %949 = vmatprep.mubr.f32.mxu0 %v351_v48  ;;  %958 = vmatprep.mubr.f32.mxu1 %v387_v4 }
 0x172   :  { %950 = vmatmul.mubr.f32.gmra.mrb[68].mxu0 %v357_v57  ;;  %959 = vmatmul.mubr.f32.gmra.mrb[20].mxu1 %v393_v62 }
 0x173   :  { %961 = vmatprep.mubr.f32.mxu1 %v399_v7 }
 0x176   :  { %962 = vmatmul.mubr.f32.gmra.mrb[22].mxu1 %v405_v63 }
 0x177   :  { %964 = vmatprep.mubr.f32.mxu1 %v411_v6 }
 0x17a   :  { %965 = vmatmul.mubr.f32.gmra.mrb[24].mxu1 %v417_v3 }
 0x1fc   :  { %v889_v5 = vpop.f32.mrb[0].mxu1 }
 0x1fd   :  { %712 = vst [vmem:[#allocation2 + $0x8] sm:$0xff] %v889_v5  ;;  %v487_v9 = vpop.f32.mrb[1].mxu1 }
 0x1fe   :  { %711 = vst [vmem:[#allocation2] sm:$0xff] %v487_v9 }
 0x200   :  { %v892_v8 = vpop.f32.mrb[2].mxu1 }
 0x201   :  { %714 = vst [vmem:[#allocation2 + $0x18] sm:$0xff] %v892_v8  ;;  %v497_v11 = vpop.f32.mrb[3].mxu1 }
 0x202   :  { %713 = vst [vmem:[#allocation2 + $0x10] sm:$0xff] %v497_v11 }
 0x204   :  { %v895_v10 = vpop.f32.mrb[4].mxu1 }
 0x205   :  { %716 = vst [vmem:[#allocation2 + $0x28] sm:$0xff] %v895_v10  ;;  %v507_v13 = vpop.f32.mrb[5].mxu1 }
 0x206   :  { %715 = vst [vmem:[#allocation2 + $0x20] sm:$0xff] %v507_v13 }
 0x208   :  { %v898_v14 = vpop.f32.mrb[6].mxu1 }
 0x209   :  { %718 = vst [vmem:[#allocation2 + $0x38] sm:$0xff] %v898_v14  ;;  %v517_v15 = vpop.f32.mrb[7].mxu1 }
 0x20a   :  { %717 = vst [vmem:[#allocation2 + $0x30] sm:$0xff] %v517_v15 }
 0x20c   :  { %v901_v12 = vpop.f32.mrb[8].mxu1 }
 0x20d   :  { %720 = vst [vmem:[#allocation2 + $0x48] sm:$0xff] %v901_v12  ;;  %v527_v49 = vpop.f32.mrb[9].mxu1 }
 0x20e   :  { %719 = vst [vmem:[#allocation2 + $0x40] sm:$0xff] %v527_v49 }
 0x210   :  { %v904_v16 = vpop.f32.mrb[10].mxu1 }
 0x211   :  { %722 = vst [vmem:[#allocation2 + $0x58] sm:$0xff] %v904_v16  ;;  %v537_v17 = vpop.f32.mrb[11].mxu1 }
 0x212   :  { %721 = vst [vmem:[#allocation2 + $0x50] sm:$0xff] %v537_v17 }
 0x214   :  { %v907_v18 = vpop.f32.mrb[12].mxu1 }
 0x215   :  { %724 = vst [vmem:[#allocation2 + $0x68] sm:$0xff] %v907_v18  ;;  %v547_v19 = vpop.f32.mrb[13].mxu1 }
 0x216   :  { %723 = vst [vmem:[#allocation2 + $0x60] sm:$0xff] %v547_v19 }
 0x218   :  { %v910_v20 = vpop.f32.mrb[14].mxu1 }
 0x219   :  { %726 = vst [vmem:[#allocation2 + $0x78] sm:$0xff] %v910_v20  ;;  %v557_v21 = vpop.f32.mrb[15].mxu1 }
 0x21a   :  { %725 = vst [vmem:[#allocation2 + $0x70] sm:$0xff] %v557_v21 }
 0x23d   :  { %v945_v22 = vpop.f32.mrb[64].mxu0  ;;  %v954_v23 = vpop.f32.mrb[16].mxu1 }
 0x23e   :  { %728 = vst [vmem:[#allocation2 + $0x88] sm:$0xff] %v945_v22  ;;  %734 = vst [vmem:[#allocation2 + $0xb8] sm:$0xff] %v954_v23  ;;  %v632_v24 = vpop.f32.mrb[65].mxu0  ;;  %v662_v25 = vpop.f32.mrb[17].mxu1 }
 0x23f   :  { %727 = vst [vmem:[#allocation2 + $0x80] sm:$0xff] %v632_v24  ;;  %733 = vst [vmem:[#allocation2 + $0xb0] sm:$0xff] %v662_v25 }
 0x241   :  { %v948_v26 = vpop.f32.mrb[66].mxu0  ;;  %v957_v27 = vpop.f32.mrb[18].mxu1 }
 0x242   :  { %730 = vst [vmem:[#allocation2 + $0x98] sm:$0xff] %v948_v26  ;;  %736 = vst [vmem:[#allocation2 + $0xc8] sm:$0xff] %v957_v27  ;;  %v642_v28 = vpop.f32.mrb[67].mxu0  ;;  %v672_v29 = vpop.f32.mrb[19].mxu1 }
 0x243   :  { %729 = vst [vmem:[#allocation2 + $0x90] sm:$0xff] %v642_v28  ;;  %735 = vst [vmem:[#allocation2 + $0xc0] sm:$0xff] %v672_v29 }
 0x245   :  { %v951_v30 = vpop.f32.mrb[68].mxu0  ;;  %v960_v31 = vpop.f32.mrb[20].mxu1 }
 0x246   :  { %732 = vst [vmem:[#allocation2 + $0xa8] sm:$0xff] %v951_v30  ;;  %v652_v32 = vpop.f32.mrb[69].mxu0  ;;  %738 = vst [vmem:[#allocation2 + $0xd8] sm:$0xff] %v960_v31  ;;  %v682_v33 = vpop.f32.mrb[21].mxu1 }
 0x247   :  { %731 = vst [vmem:[#allocation2 + $0xa0] sm:$0xff] %v652_v32  ;;  %737 = vst [vmem:[#allocation2 + $0xd0] sm:$0xff] %v682_v33 }
 0x249   :  { %v963_v34 = vpop.f32.mrb[22].mxu1 }
 0x24a   :  { %740 = vst [vmem:[#allocation2 + $0xe8] sm:$0xff] %v963_v34  ;;  %v692_v35 = vpop.f32.mrb[23].mxu1 }
 0x24b   :  { %739 = vst [vmem:[#allocation2 + $0xe0] sm:$0xff] %v692_v35 }
 0x24d   :  { %v966_v36 = vpop.f32.mrb[24].mxu1 }
 0x24e   :  { %742 = vst [vmem:[#allocation2 + $0xf8] sm:$0xff] %v966_v36  ;;  %v702_v37 = vpop.f32.mrb[25].mxu1 }
 0x24f   :  { %741 = vst [vmem:[#allocation2 + $0xf0] sm:$0xff] %v702_v37 }
 0x250   :  { %1070 = shalt.err (!%p1067_p4)
}
 0x251   :  { %s1071_s13 = scalar_lea.hbm %s1440_s3, 4096 }
 0x252   :  { %p1072_p5 = scmp.ne.s32.totalorder %s1440_s3, %s1071_s13  ;;  %p1075_p6 = scmp.lt.u32.totalorder %s1071_s13, %s1440_s3 }
 0x254   :  { %p1077_p7 = pnand %p1075_p6, %p1072_p5 }
 0x256   :  { %1080 = shalt.err (!%p1077_p7)
}
 0x257   :  { %s1085_s18 = smov 128   ;;  %s1086_s19 = smov 8  }
 0x258   :  { %754 = dma.vmem_to_hbm [thread:$0]  %s749_s2, 4096, %s1440_s3, [#allocation3], %s1085_s18, %s1085_s18, %s1086_s19  }
 0x259   :  { %1081 = dma.done.wait [#allocation3], 4096  }
 0x25a   :  { %1082 = vsyncadd [#allocation3], 4294963200 }
 0x25b   :  { %758 = vsyncpa [#allocation3], 1 }

</bundles_post_ra>
